<compile_context>
chip_gen: v5e
topology: v5e:2x2
jax: 0.10.0
libtpu: 0.0.40
codegen_flags: <defaults>
</compile_context>

<pallas_src>
import jax
import jax.numpy as jnp
from jax.experimental import pallas as pl
from jax.experimental.pallas import tpu as pltpu


# ----------------------------- fused Pallas kernel --------------------------

def _make_fused_kernel(W, HW, F, Nb, hidden, n_classes):
    """Fused conv + ReLU + 3x3/stride-1 max pool + FC for Nb images per step.

    Transposed activation layout: hidden on sublanes, flat spatial position
    r = i*W + j on lanes, images stacked along lanes at stride HW.
    Rows whose j runs past the valid conv/pool width are junk; they are either
    never read for valid outputs or hit zero FC weights.
    """
    L = Nb * HW           # lanes per step
    LJ = L - 2            # length after the j-direction (width) max
    LP = LJ - 2 * W       # length after the i-direction (height) max
    # static bound checks (brittle-layout guard requested by the review)
    assert F <= HW
    assert (Nb - 1) * HW + F <= LP, "FC slice would run past the pooled block"

    def kernel(p_ref, wc_ref, bc_ref, wf_ref, mask_ref, g_ref, bf_ref, out_ref):
        # ---- conv: ONE MXU matmul, contraction depth K*K*C ------------------
        conv = jnp.dot(wc_ref[...], p_ref[...],
                       preferred_element_type=jnp.float32)        # (hidden, L)
        conv = jnp.maximum(conv + bc_ref[...], 0.0)                # bias + ReLU (f32)

        # ---- separable 3x3, stride-1 max pool on the flat layout ------------
        tj = jnp.maximum(jnp.maximum(conv[:, 0:LJ], conv[:, 1:LJ + 1]),
                         conv[:, 2:LJ + 2])                        # width dir
        pooled = jnp.maximum(jnp.maximum(tj[:, 0:LP], tj[:, W:LP + W]),
                             tj[:, 2 * W:LP + 2 * W])              # height dir
        pooled = pooled.astype(jnp.bfloat16)                       # (hidden, LP)

        # ---- FC through the MXU ---------------------------------------------
        # Z[h', n*hidden + h] = sum_r pooled[h', r] * W_fc[n, r, h]
        # scores[n]           = sum_h Z[h, n*hidden + h]
        for b in range(Nb):
            pb = pooled[:, b * HW:b * HW + F]                      # (hidden, F)
            z = jnp.dot(pb, wf_ref[...],
                        preferred_element_type=jnp.float32)        # (hidden, nc*hidden)
            col = jnp.sum(z * mask_ref[...], axis=0, keepdims=True)  # (1, nc*hidden)
            scores = jnp.dot(col, g_ref[...],
                             preferred_element_type=jnp.float32)   # (1, nc)
            out_ref[0, b:b + 1, :] = scores + bf_ref[...]

    return kernel


# ------------------------- one-time parameter prep --------------------------

def prepare_params(w_conv, b_conv, w_fc, b_fc, im_size):
    """Precompute kernel-layout weights (call once, outside the jitted fwd)."""
    C, H, W = im_size
    hidden, _, K, _ = w_conv.shape
    n_classes = w_fc.shape[0]
    Ho, Wo = H - K + 1, W - K + 1
    Hp, Wp = Ho - 2, Wo - 2                   # MaxPool2d(3, stride=1)
    HW = H * W
    F = Hp * W                                # flat pooled rows used by the FC

    # conv weight (hidden, C, K, K) -> (hidden, K*K*C), (kh,kw) major / c minor
    wct = jnp.transpose(w_conv, (0, 2, 3, 1)).reshape(hidden, K * K * C)
    wct = wct.astype(jnp.bfloat16)
    bc = b_conv.reshape(hidden, 1).astype(jnp.float32)

    # FC weight: torch flatten order is (h, i, j).  Re-index to flat rows
    # r = i*W + j, zero-pad the junk columns, lay out lanes as n*hidden + h.
    w4 = w_fc.reshape(n_classes, hidden, Hp, Wp)
    wpad = jnp.zeros((n_classes, hidden, H, W), w_fc.dtype)
    wpad = wpad.at[:, :, :Hp, :Wp].set(w4)
    wb = jnp.transpose(wpad[:, :, :Hp + 0, :], (2, 3, 0, 1))       # (Hp, W, nc, hidden)
    wb = wb.reshape(F, n_classes * hidden).astype(jnp.bfloat16)

    # diagonal-extraction mask and lane-group-sum matrix for the FC epilogue
    mask = jnp.tile(jnp.eye(hidden, dtype=jnp.float32), (1, n_classes))
    gmat = jnp.repeat(jnp.eye(n_classes, dtype=jnp.float32), hidden, axis=0)
    bfc = b_fc.reshape(1, n_classes).astype(jnp.float32)
    return wct, bc, wb, mask, gmat, bfc


# ------------------------------ fused forward --------------------------------

@jax.jit
def cnn_forward(images, wct, bc, wb, mask, gmat, bfc):
    """images: (N, C, H, W) NCHW.  Returns (N, n_classes) scores."""
    N, C, H, W = images.shape
    hidden, KKC = wct.shape
    K = int(round((KKC // C) ** 0.5))
    n_classes = gmat.shape[1]
    F = wb.shape[0]
    HW = H * W

    # images per grid step: amortize per-step overhead, keep >= 2 parallel
    # steps for v7x's two TensorCores whenever N >= 2
    Nb = max(1, min(8, N // 2)) if N >= 2 else 1
    G = -(-N // Nb)
    Np = G * Nb
    assert (Nb * HW) % 128 == 0, "per-step lane block must be 128-aligned"

    # Layout prep (XLA, streaming): NCHW -> per-image flat (H*W, C), pad the
    # tail rows for the shifted taps and the batch up to a multiple of Nb,
    # then build the im2col patch matrix, transposed with images along lanes.
    x = jnp.transpose(images, (0, 2, 3, 1)).reshape(N, HW, C)
    x = jnp.pad(x, ((0, Np - N), (0, (K - 1) * (W + 1)), (0, 0)))
    offs = [kh * W + kw for kh in range(K) for kw in range(K)]
    patches = jnp.stack([x[:, s:s + HW, :] for s in offs], axis=2)  # (Np, HW, K*K, C)
    patches = patches.reshape(Np, HW, KKC)
    patches_t = jnp.transpose(patches, (2, 0, 1)).reshape(KKC, Np * HW)
    patches_t = patches_t.astype(jnp.bfloat16)

    out = pl.pallas_call(
        _make_fused_kernel(W, HW, F, Nb, hidden, n_classes),
        out_shape=jax.ShapeDtypeStruct((G, Nb, n_classes), jnp.float32),
        grid=(G,),
        in_specs=[
            pl.BlockSpec((KKC, Nb * HW), lambda g: (0, g)),
            pl.BlockSpec((hidden, KKC), lambda g: (0, 0)),
            pl.BlockSpec((hidden, 1), lambda g: (0, 0)),
            pl.BlockSpec((F, n_classes * hidden), lambda g: (0, 0)),
            pl.BlockSpec((hidden, n_classes * hidden), lambda g: (0, 0)),
            pl.BlockSpec((n_classes * hidden, n_classes), lambda g: (0, 0)),
            pl.BlockSpec((1, n_classes), lambda g: (0, 0)),
        ],
        out_specs=pl.BlockSpec((1, Nb, n_classes), lambda g: (g, 0, 0)),
        compiler_params=pltpu.CompilerParams(
            dimension_semantics=("parallel",)),
    )(patches_t, wct, bc, wb, mask, gmat, bfc)
    return out.reshape(Np, n_classes)[:N]


# ------------------------------ pure-JAX reference ---------------------------

def cnn_reference(images, w_conv, b_conv, w_fc, b_fc):
    h = jax.lax.conv_general_dilated(
        images, w_conv, window_strides=(1, 1), padding="VALID",
        dimension_numbers=("NCHW", "OIHW", "NCHW"),
        precision=jax.lax.Precision.HIGHEST,
    )
    h = jnp.maximum(h + b_conv[None, :, None, None], 0.0)
    h = jax.lax.reduce_window(
        h, -jnp.inf, jax.lax.max, (1, 1, 3, 3), (1, 1, 1, 1), "VALID"
    )
    n = images.shape[0]
    h = h.reshape(n, -1)
    return jnp.dot(h, w_fc.T, precision=jax.lax.Precision.HIGHEST) + b_fc


# ------------------------------ main -----------------------------------------

if __name__ == "__main__":
    # CNN(im_size=(4, 16, 16), hidden_dim=32, kernel_size=3, n_classes=10)
    N, C, H, W = 2, 4, 16, 16
    hidden_dim, kernel_size, n_classes = 32, 3, 10
    Ho, Wo = H - kernel_size + 1, W - kernel_size + 1
    Hp, Wp = Ho - 2, Wo - 2

    key = jax.random.PRNGKey(0)
    k1, k2, k3, k4, k5 = jax.random.split(key, 5)

    fan_conv = C * kernel_size * kernel_size
    w_conv = jax.random.uniform(k1, (hidden_dim, C, kernel_size, kernel_size),
                                jnp.float32, -1.0, 1.0) / jnp.sqrt(fan_conv)
    b_conv = jax.random.uniform(k2, (hidden_dim,), jnp.float32, -1.0, 1.0) / jnp.sqrt(fan_conv)

    fan_fc = hidden_dim * Hp * Wp
    w_fc = jax.random.uniform(k3, (n_classes, fan_fc), jnp.float32, -1.0, 1.0) / jnp.sqrt(fan_fc)
    b_fc = jax.random.uniform(k4, (n_classes,), jnp.float32, -1.0, 1.0) / jnp.sqrt(fan_fc)

    images = jax.random.normal(k5, (N, C, H, W), jnp.float32)

    # one-time weight-layout prep (outside the jitted forward)
    params = prepare_params(w_conv, b_conv, w_fc, b_fc, (C, H, W))

    scores = cnn_forward(images, *params)
    scores = jax.block_until_ready(scores)

    ref = cnn_reference(images, w_conv, b_conv, w_fc, b_fc)
    assert scores.shape == (N, n_classes), scores.shape
    # bf16 matmul inputs (single-pass MXU) vs f32 HIGHEST reference -> ~1e-3
    # absolute error on O(0.4)-magnitude scores; 2e-2 tolerance is comfortable.
    assert jnp.allclose(scores, ref, rtol=2e-2, atol=2e-2), (
        f"max abs diff = {jnp.max(jnp.abs(scores - ref))}")

    print("KERNEL_OK")
</pallas_src>

<mosaic_0001>
module attributes {stable_mosaic.version = 11 : i64} {
  func.func @kernel(%arg0: i32, %arg1: memref<36x256xbf16, #tpu.memory_space<vmem>>, %arg2: memref<32x36xbf16, #tpu.memory_space<vmem>>, %arg3: memref<32x1xf32, #tpu.memory_space<vmem>>, %arg4: memref<192x320xbf16, #tpu.memory_space<vmem>>, %arg5: memref<32x320xf32, #tpu.memory_space<vmem>>, %arg6: memref<320x10xf32, #tpu.memory_space<vmem>>, %arg7: memref<1x10xf32, #tpu.memory_space<vmem>>, %arg8: memref<1x1x10xf32, #tpu.memory_space<vmem>>) attributes {dimension_semantics = [#tpu.dimension_semantics<parallel>], iteration_bounds = array<i64: 2>, scalar_prefetch = 0 : i64, scratch_operands = 0 : i64, tpu.core_type = #tpu.core_type<tc>, window_params = [{transform_indices = @transform_0, window_bounds = array<i64: 36, 256>}, {pipeline_mode = #tpu.pipeline_mode<synchronous>, transform_indices = @transform_1, window_bounds = array<i64: 32, 36>}, {pipeline_mode = #tpu.pipeline_mode<synchronous>, transform_indices = @transform_2, window_bounds = array<i64: 32, 1>}, {pipeline_mode = #tpu.pipeline_mode<synchronous>, transform_indices = @transform_3, window_bounds = array<i64: 192, 320>}, {pipeline_mode = #tpu.pipeline_mode<synchronous>, transform_indices = @transform_4, window_bounds = array<i64: 32, 320>}, {pipeline_mode = #tpu.pipeline_mode<synchronous>, transform_indices = @transform_5, window_bounds = array<i64: 320, 10>}, {pipeline_mode = #tpu.pipeline_mode<synchronous>, transform_indices = @transform_6, window_bounds = array<i64: 1, 10>}, {transform_indices = @transform_7, window_bounds = array<i64: 1, 1, 10>}]} {
    %c0 = arith.constant 0 : index
    %c0_0 = arith.constant 0 : index
    %0 = vector.load %arg2[%c0, %c0_0] : memref<32x36xbf16, #tpu.memory_space<vmem>>, vector<32x36xbf16>
    %c0_1 = arith.constant 0 : index
    %c0_2 = arith.constant 0 : index
    %1 = vector.load %arg1[%c0_1, %c0_2] : memref<36x256xbf16, #tpu.memory_space<vmem>>, vector<36x256xbf16>
    %cst = arith.constant dense<0.000000e+00> : vector<32x256xf32>
    %2 = tpu.matmul %0, %1, %cst {dimension_numbers = #tpu.dot_dimension_numbers<[1], [0], [0], [1], [0, 0, 1, 1], [], []>} : vector<32x36xbf16>, vector<36x256xbf16>, vector<32x256xf32> -> vector<32x256xf32>
    %c0_3 = arith.constant 0 : index
    %c0_4 = arith.constant 0 : index
    %3 = vector.load %arg3[%c0_3, %c0_4] : memref<32x1xf32, #tpu.memory_space<vmem>>, vector<32x1xf32>
    %4 = vector.broadcast %3 : vector<32x1xf32> to vector<32x256xf32>
    %5 = arith.addf %2, %4 : vector<32x256xf32>
    %cst_5 = arith.constant 0.000000e+00 : f32
    %6 = vector.broadcast %cst_5 : f32 to vector<32x256xf32>
    %7 = arith.maximumf %5, %6 : vector<32x256xf32>
    %8 = vector.extract_strided_slice %7 {offsets = [0, 0], sizes = [32, 254], strides = [1, 1]} : vector<32x256xf32> to vector<32x254xf32>
    %9 = vector.extract_strided_slice %7 {offsets = [0, 1], sizes = [32, 254], strides = [1, 1]} : vector<32x256xf32> to vector<32x254xf32>
    %10 = arith.maximumf %8, %9 : vector<32x254xf32>
    %11 = vector.extract_strided_slice %7 {offsets = [0, 2], sizes = [32, 254], strides = [1, 1]} : vector<32x256xf32> to vector<32x254xf32>
    %12 = arith.maximumf %10, %11 : vector<32x254xf32>
    %13 = vector.extract_strided_slice %12 {offsets = [0, 0], sizes = [32, 222], strides = [1, 1]} : vector<32x254xf32> to vector<32x222xf32>
    %14 = vector.extract_strided_slice %12 {offsets = [0, 16], sizes = [32, 222], strides = [1, 1]} : vector<32x254xf32> to vector<32x222xf32>
    %15 = arith.maximumf %13, %14 : vector<32x222xf32>
    %16 = vector.extract_strided_slice %12 {offsets = [0, 32], sizes = [32, 222], strides = [1, 1]} : vector<32x254xf32> to vector<32x222xf32>
    %17 = arith.maximumf %15, %16 : vector<32x222xf32>
    %18 = arith.truncf %17 : vector<32x222xf32> to vector<32x222xbf16>
    %19 = vector.extract_strided_slice %18 {offsets = [0, 0], sizes = [32, 192], strides = [1, 1]} : vector<32x222xbf16> to vector<32x192xbf16>
    %c0_6 = arith.constant 0 : index
    %c0_7 = arith.constant 0 : index
    %20 = vector.load %arg4[%c0_6, %c0_7] : memref<192x320xbf16, #tpu.memory_space<vmem>>, vector<192x320xbf16>
    %cst_8 = arith.constant dense<0.000000e+00> : vector<32x320xf32>
    %21 = tpu.matmul %19, %20, %cst_8 {dimension_numbers = #tpu.dot_dimension_numbers<[1], [0], [0], [1], [0, 0, 1, 1], [], []>} : vector<32x192xbf16>, vector<192x320xbf16>, vector<32x320xf32> -> vector<32x320xf32>
    %c0_9 = arith.constant 0 : index
    %c0_10 = arith.constant 0 : index
    %22 = vector.load %arg5[%c0_9, %c0_10] : memref<32x320xf32, #tpu.memory_space<vmem>>, vector<32x320xf32>
    %23 = arith.mulf %21, %22 : vector<32x320xf32>
    %cst_11 = arith.constant dense<0.000000e+00> : vector<320xf32>
    %24 = vector.multi_reduction <add>, %23, %cst_11 [0] : vector<32x320xf32> to vector<320xf32>
    %25 = vector.shape_cast %24 : vector<320xf32> to vector<1x320xf32>
    %c0_12 = arith.constant 0 : index
    %c0_13 = arith.constant 0 : index
    %26 = vector.load %arg6[%c0_12, %c0_13] : memref<320x10xf32, #tpu.memory_space<vmem>>, vector<320x10xf32>
    %cst_14 = arith.constant dense<0.000000e+00> : vector<1x10xf32>
    %27 = tpu.matmul %25, %26, %cst_14 {dimension_numbers = #tpu.dot_dimension_numbers<[1], [0], [0], [1], [0, 0, 1, 1], [], []>} : vector<1x320xf32>, vector<320x10xf32>, vector<1x10xf32> -> vector<1x10xf32>
    %c0_15 = arith.constant 0 : index
    %c0_16 = arith.constant 0 : index
    %28 = vector.load %arg7[%c0_15, %c0_16] : memref<1x10xf32, #tpu.memory_space<vmem>>, vector<1x10xf32>
    %29 = arith.addf %27, %28 : vector<1x10xf32>
    %c0_17 = arith.constant 0 : index
    %c0_18 = arith.constant 0 : index
    %c0_19 = arith.constant 0 : index
    %30 = vector.load %arg8[%c0_17, %c0_18, %c0_19] : memref<1x1x10xf32, #tpu.memory_space<vmem>>, vector<1x1x10xf32>
    %31 = vector.shape_cast %30 : vector<1x1x10xf32> to vector<1x10xf32>
    %32 = vector.shape_cast %29 : vector<1x10xf32> to vector<1x1x10xf32>
    tpu.vector_store %arg8[%c0_17, %c0_18, %c0_19], %32 {strides = array<i32>} : memref<1x1x10xf32, #tpu.memory_space<vmem>>, vector<1x1x10xf32>,
    return
  }
  func.func @transform_0(%arg0: i32) -> (i32, i32) {
    %c0_i32 = arith.constant 0 : i32
    %c0_i32_0 = arith.constant 0 : i32
    return %c0_i32, %arg0 : i32, i32
  }
  func.func @transform_1(%arg0: i32) -> (i32, i32) {
    %c0_i32 = arith.constant 0 : i32
    %c0_i32_0 = arith.constant 0 : i32
    %c0_i32_1 = arith.constant 0 : i32
    return %c0_i32, %c0_i32_0 : i32, i32
  }
  func.func @transform_2(%arg0: i32) -> (i32, i32) {
    %c0_i32 = arith.constant 0 : i32
    %c0_i32_0 = arith.constant 0 : i32
    %c0_i32_1 = arith.constant 0 : i32
    return %c0_i32, %c0_i32_0 : i32, i32
  }
  func.func @transform_3(%arg0: i32) -> (i32, i32) {
    %c0_i32 = arith.constant 0 : i32
    %c0_i32_0 = arith.constant 0 : i32
    %c0_i32_1 = arith.constant 0 : i32
    return %c0_i32, %c0_i32_0 : i32, i32
  }
  func.func @transform_4(%arg0: i32) -> (i32, i32) {
    %c0_i32 = arith.constant 0 : i32
    %c0_i32_0 = arith.constant 0 : i32
    %c0_i32_1 = arith.constant 0 : i32
    return %c0_i32, %c0_i32_0 : i32, i32
  }
  func.func @transform_5(%arg0: i32) -> (i32, i32) {
    %c0_i32 = arith.constant 0 : i32
    %c0_i32_0 = arith.constant 0 : i32
    %c0_i32_1 = arith.constant 0 : i32
    return %c0_i32, %c0_i32_0 : i32, i32
  }
  func.func @transform_6(%arg0: i32) -> (i32, i32) {
    %c0_i32 = arith.constant 0 : i32
    %c0_i32_0 = arith.constant 0 : i32
    %c0_i32_1 = arith.constant 0 : i32
    return %c0_i32, %c0_i32_0 : i32, i32
  }
  func.func @transform_7(%arg0: i32) -> (i32, i32, i32) {
    %c0_i32 = arith.constant 0 : i32
    %c0_i32_0 = arith.constant 0 : i32
    %c0_i32_1 = arith.constant 0 : i32
    return %arg0, %c0_i32, %c0_i32_0 : i32, i32, i32
  }
}

</mosaic_0001>

<bundles_post_ra>
// kernel: cnn_forward.1
= control target key start
LH: loop header
LB: loop body
LE: loop exit
PB: predicated region body
PF: predicated region fallthrough
CT: control target
= control target key end

     0   :  { %12 = vsyncpa [#allocation4], 0  ;;  %s2273_s0 = inlined_call_operand.vmem [shape: bf16[36,512], index: 0, kind: input, shape index: {}]   ;;  %s2274_s1 = inlined_call_operand.vmem [shape: bf16[32,36], index: 1, kind: input, shape index: {}]   ;;  %s2275_s2 = inlined_call_operand.vmem [shape: f32[32,1], index: 2, kind: input, shape index: {}]   ;;  %s2276_s3 = inlined_call_operand.vmem [shape: bf16[192,320], index: 3, kind: input, shape index: {}]   ;;  %s2277_s4 = inlined_call_operand.vmem [shape: f32[32,320], index: 4, kind: input, shape index: {}]   ;;  %s2278_s5 = inlined_call_operand.vmem [shape: f32[320,10], index: 5, kind: input, shape index: {}]   ;;  %s2279_s6 = inlined_call_operand.vmem [shape: f32[1,10], index: 6, kind: input, shape index: {}]   ;;  %s2280_s7 = inlined_call_operand.hbm [shape: f32[2,1,10], index: 7, kind: output, shape index: {}]  }
   0x1   :  { %14 = vsyncpa [#allocation4 + $0x1], 0  ;;  %s1707_s24 = smov 0   ;;  %s1709_s25 = smov 0  }
   0x2   :  { %s1711_s26 = smov 0   ;;  %s1713_s27 = smov 0  }
   0x3 LB: > { %s1239_s28 = sadd.s32 4294967295, %s1660_s27   ;;  %s1240_s29 = sadd.s32 4294967294, %s1660_s27   ;;  %s1660_s27 = sphi %s1713_s27, %s2286_s27   ;;  %s1656_s26 = sphi %s1711_s26, %s2285_s26   ;;  %s1652_s25 = sphi %s1709_s25, %s2284_s25   ;;  %s1648_s24 = sphi %s1707_s24, %s2283_s24  }
   0x4   : > { %s1730_s30 = sadd.s32 1, %s1660_s27   ;;  %s27_s8 = sadd.s32 1, %s1656_s26 }
   0x5   : > { %s24_s9 = ssub.s32 %s1660_s27, %s1730_s30  ;;  %p34_p0 = scmp.ne.s32.totalorder %s1656_s26, %s1652_s25 }
   0x6   : > { %p25_p1 = scmp.eq.s32.totalorder %s24_s9, 0  ;;  %p35_p2 = scmp.eq.s32.totalorder %s1660_s27, 0 }
   0x7   : > { %p190_p3 = scmp.eq.s32.totalorder %s1239_s28, 1  ;;  %p195_p4 = scmp.ne.s32.totalorder %s1652_s25, %s1648_s24 }
   0x8   : > { %s1743_s10 = scalar_select %p25_p1, %s1656_s26, %s27_s8  }
   0x9   : > { %p36_p5 = por %p35_p2, %p34_p0  ;;  %p1745_p6 = por %p190_p3, %p34_p0 }
   0xa   : > { %p196_p7 = scmp.eq.s32.totalorder %s1240_s29, 1  ;;  %p1242_p9 = scmp.ge.s32.totalorder %s1660_s27, 2 }
   0xc   : > { %p1749_p8 = por %p196_p7, %p195_p4  ;;  %230 = sbr.rel (%p1242_p9) target bundleno = 26 (0x1a), region = 40 }
  0x11   : > { %233 = sbr.rel (!%p36_p5) target bundleno = 26 (0x1a), region = 44  ;;  %s235_s13 = sand.u32 (%p36_p5), 1, %s1656_s26  }
  0x12   : > { %s1427_s14 = sshll.u32 (%p36_p5), %s1660_s27, 3  ;;  %s1470_s15 = smul.u32 (%p36_p5), 40, %s235_s13 }
  0x13   : > { %s240_s18 = scalar_lea.vmem (%p36_p5), %s2273_s0, %s1427_s14 }
  0x14   : > { %v277_v0 = vld [vmem:[%s240_s18] sm:$0xff] (%p36_p5)  ;;  %v279_v1 = vld [vmem:[%s240_s18 + $0x10] sm:$0xff] (%p36_p5)  ;;  %s237_s19 = scalar_lea.vmem (%p36_p5), [#allocation2], %s1470_s15 }
  0x15   : > { %v281_v2 = vld [vmem:[%s240_s18 + $0x20] sm:$0xff] (%p36_p5)  ;;  %278 = vst [vmem:[%s237_s19] sm:$0xff] (%p36_p5), %v277_v0  ;;  %v283_v3 = vld [vmem:[%s240_s18 + $0x30] sm:$0xff] (%p36_p5) }
  0x16   : > { %280 = vst [vmem:[%s237_s19 + $0x8] sm:$0xff] %v279_v1  ;;  %v285_v4 = vld [vmem:[%s240_s18 + $0x40] sm:$0xff] }
  0x17   : > { %282 = vst [vmem:[%s237_s19 + $0x10] sm:$0xff] %v281_v2 }
  0x18   : > { %284 = vst [vmem:[%s237_s19 + $0x18] sm:$0xff] %v283_v3 }
  0x19   : > { %286 = vst [vmem:[%s237_s19 + $0x20] sm:$0xff] %v285_v4 }
  0x1a PF: > { %p1245_p10 = scmp.ge.s32.totalorder %s1660_s27, 1  ;;  %p291_p11 = scmp.lt.s32.totalorder %s1660_s27, 3 }
  0x1c   : > { %p292_p12 = pnand %p1245_p10, %p291_p11 }
  0x1d   : > { %s1764_s20 = sand.u32 (!%p292_p12), 1, %s1652_s25   ;;  %s1663_s22 = smov (!%p292_p12), 126  }
  0x1e   : > { %295 = sbr.rel (%p292_p12) target bundleno = 787 (0x313), region = 82  ;;  %s1666_s8 = smov (!%p292_p12), 112  }
  0x1f   : > { %s1471_s23 = smul.u32 (!%p292_p12), 40, %s1764_s20  ;;  %s1175_s17 = scalar_lea.hbm (!%p292_p12), %s2280_s7, %s1239_s28 }
  0x20   : > { %s327_s18 = scalar_lea.vmem (!%p292_p12), [#allocation3], %s1764_s20  ;;  %s1179_s21 = sshll.u32 (!%p292_p12), %s1175_s17, 4  ;;  %s1180_s21 = int_to_ptr.hbm [resolvable:$true] %s1179_s21 }
  0x21   : > { %s300_s29 = scalar_lea.vmem (!%p292_p12), [#allocation2], %s1471_s23  ;;  %s1664_s23 = smov (!%p292_p12), 127  }
  0x22   : > { %s1177_s19 = sshll.u32 (!%p292_p12), %s327_s18, 4  ;;  %s1618_s9 = scalar_lea.hbm (!%p292_p12), %s2280_s7, 2  ;;  %s1178_s19 = int_to_ptr.vmem [resolvable:$true] %s1177_s19 }
  0x23   : > { %v339_v5 = vld [vmem:[%s2275_s2] sm:$0xff]  ;;  %v1662_v6 = vmov 0   ;;  %vm405_vm0 = vcmask 1041408   ;;  %v1264_v10 = vld [vmem:[%s300_s29 + $0x10] sm:$0xf]  ;;  %v340_v17 = vld [vmem:[%s2275_s2 + $0x8] sm:$0xff] }
  0x24   : > { %1516 = vset.pattern.permute.xlu0 %v1662_v6  ;;  %1517 = vset.pattern.permute.xlu1 %v1662_v6  ;;  %v338_v7 = vld [vmem:[%s300_s29 + $0x20] sm:$0x33]  ;;  %v1433_v11 = vld [vmem:[%s300_s29 + $0x14] sm:$0xf0]  ;;  %v1432_v14 = vld [vmem:[%s300_s29 + $0x14] sm:$0xf] }
  0x25   : > { %345 = vperm.xlu0 %1516, %v339_v5   ;;  %v386_v8 = vunpack.c.l.b16 %v338_v7  ;;  %v387_v9 = vunpack.c.h.b16 %v338_v7  ;;  %v1266_v15 = vld [vmem:[%s300_s29 + $0x18] sm:$0xf0]  ;;  %v341_v16 = vld [vmem:[%s2275_s2 + $0x10] sm:$0xff]  ;;  %v1265_v20 = vor.u32 %v1433_v11, %v1264_v10  ;;  %v1256_v22 = vld [vmem:[%s300_s29] sm:$0xf]  ;;  %vm398_vm1 = vcmask 293888  }
  0x26   : > { %355 = vperm.xlu1 %1517, %v341_v16   ;;  %v1269_v21 = vor.u32 %v1432_v14, %v1266_v15  ;;  %v1431_v23 = vld [vmem:[%s300_s29 + $0x4] sm:$0xf0]  ;;  %v1430_v24 = vld [vmem:[%s300_s29 + $0x4] sm:$0xf]  ;;  %v1258_v25 = vld [vmem:[%s300_s29 + $0x8] sm:$0xf0] }
  0x27   : > { %v392_v12 = vpack.c.b16 %v386_v8, %v386_v8  ;;  %v393_v13 = vpack.c.b16 %v387_v9, %v387_v9  ;;  %v342_v26 = vld [vmem:[%s2275_s2 + $0x18] sm:$0xff]  ;;  %v1257_v27 = vor.u32 %v1431_v23, %v1256_v22  ;;  %v1261_v28 = vor.u32 %v1430_v24, %v1258_v25  ;;  %v1428_v29 = vld [vmem:[%s2274_s1] sm:$0xff]  ;;  %v1429_v30 = vld [vmem:[%s2274_s1 + $0x8] sm:$0xff]  ;;  %s1665_s29 = smov 96  }
  0x28   : > { %vm482_vm2 = vcmask 1039360   ;;  %vm519_vm3 = vcmask 1031168   ;;  %vm564_vm4 = vcmask 916480   ;;  %vm601_vm5 = vcmask 785408  }
  0x29   : > { %v407_v18 = vsel %vm405_vm0, %v392_v12, 0  ;;  %v410_v19 = vsel %vm405_vm0, %v393_v13, 0  ;;  %vm884_vm6 = vcmask 523264   ;;  %vm1164_vm7 = vcmask 73728  }
  0x2a   : > { %417 = vmatpush.bf16.msra.mxu0 %v407_v18  ;;  %436 = vmatpush.bf16.msra.mxu1 %v410_v19 }
  0x2d   : > { %350 = vperm.xlu0 %1516, %v340_v17  }
  0x2e   : > { %418 = vmatpush.bf16.msra.mxu0 %v1265_v20  ;;  %437 = vmatpush.bf16.msra.mxu1 %v1269_v21 }
  0x2f   : > { %360 = vperm.xlu1 %1517, %v342_v26  }
  0x32   : > { %419 = vmatpush.bf16.msra.mxu0 %v1257_v27  ;;  %438 = vmatpush.bf16.msra.mxu1 %v1261_v28 }
  0x35   : > { %1270 = vmatmul.msk.bf16.vlgmr.msra.gmra.mxu0 %vm398_vm1, %v1428_v29  ;;  %1272 = vmatmul.msk.bf16.vlgmr.msra.gmra.mxu1 %vm398_vm1, %v1428_v29 }
  0x45   : > { %1271 = vmatmul.msk.bf16.gmra.mxu0 %vm398_vm1, %v1429_v30  ;;  %1273 = vmatmul.msk.bf16.gmra.mxu1 %vm398_vm1, %v1429_v30 }
  0x97   : > { %v346_v31 = vpop.permute.xlu0 %345 }
  0x98   : > { %v356_v46 = vpop.permute.xlu1 %355 }
  0x9f   : > { %v351_v39 = vpop.permute.xlu0 %350 }
  0xa1   : > { %v361_v55 = vpop.permute.xlu1 %360 }
  0xb2   : > { %v421_v32 = vpop.f32.mrf.mxu0  ;;  %v440_v33 = vpop.f32.mrf.mxu1 }
  0xb3   : > { %v422_v34 = vadd.f32 %v421_v32, %v346_v31  ;;  %v441_v35 = vadd.f32 %v440_v33, %v346_v31 }
  0xb5   : > { %v450_v36 = vmax.f32 %v422_v34, 0.0  ;;  %v451_v37 = vmax.f32 %v441_v35, 0.0 }
  0xb7   : > { %v1528_v38 = vpack.i.bf16 %v451_v37, %v450_v36 }
  0xb9   : > { %1529 = vrot.lane.b32.xlu0 %v1528_v38, %s1663_s22  ;;  %1519 = vrot.lane.b32.xlu2 %v1528_v38, %s1664_s23 }
  0xba   : > { %v423_v40 = vpop.f32.mrf.mxu0  ;;  %v442_v41 = vpop.f32.mrf.mxu1 }
  0xbb   : > { %v424_v42 = vadd.f32 %v423_v40, %v351_v39  ;;  %v443_v43 = vadd.f32 %v442_v41, %v351_v39 }
  0xbd   : > { %v452_v44 = vmax.f32 %v424_v42, 0.0  ;;  %v453_v45 = vmax.f32 %v443_v43, 0.0 }
  0xbf   : > { %v1533_v47 = vpack.i.bf16 %v453_v45, %v452_v44 }
  0xc1   : > { %1534 = vrot.lane.b32.xlu1 %v1533_v47, %s1663_s22  ;;  %1524 = vrot.lane.b32.xlu2 %v1533_v47, %s1664_s23 }
  0xc2   : > { %v426_v48 = vpop.f32.mrf.mxu0  ;;  %v445_v49 = vpop.f32.mrf.mxu1 }
  0xc3   : > { %v427_v50 = vadd.f32 %v426_v48, %v356_v46  ;;  %v446_v51 = vadd.f32 %v445_v49, %v356_v46 }
  0xc5   : > { %v454_v52 = vmax.f32 %v427_v50, 0.0  ;;  %v455_v53 = vmax.f32 %v446_v51, 0.0  ;;  %v1360_v51 = vld [vmem:[%s2276_s3 + $0xa8] sm:$0xf] }
  0xc7   : > { %v1548_v54 = vpack.i.bf16 %v455_v53, %v454_v52 }
  0xc9   : > { %1549 = vrot.lane.b32.xlu1 %v1548_v54, %s1663_s22  ;;  %1539 = vrot.lane.b32.xlu2 %v1548_v54, %s1664_s23 }
  0xca   : > { %v428_v56 = vpop.f32.mrf.mxu0  ;;  %v447_v57 = vpop.f32.mrf.mxu1 }
  0xcb   : > { %v1788_v58 = vadd.f32 %v428_v56, %v361_v55  ;;  %v448_v59 = vadd.f32 %v447_v57, %v361_v55  ;;  %v1362_v55 = vld [vmem:[%s2276_s3 + $0xb4] sm:$0xf0]  ;;  %v1348_v56 = vld [vmem:[%s2276_s3 + $0x90] sm:$0xf]  ;;  %v1453_v57 = vld [vmem:[%s2276_s3 + $0x98] sm:$0xf0] }
  0xcd   : > { %v456_v60 = vmax.f32 %v1788_v58, 0.0  ;;  %v457_v61 = vmax.f32 %v448_v59, 0.0  ;;  %v1452_v59 = vld [vmem:[%s2276_s3 + $0x94] sm:$0xf] }
  0xcf   : > { %v1543_v62 = vpack.i.bf16 %v457_v61, %v456_v60 }
  0xd1   : > { %1544 = vrot.lane.b32.xlu0 %v1543_v62, %s1664_s23  ;;  %1554 = vrot.lane.b32.xlu2 %v1543_v62, %s1663_s22  ;;  %s1167_s22 = scalar_lea.sflag [#allocation4], %s1764_s20  ;;  %s1612_s23 = sshra.s32 %s1180_s21, 4  ;;  %s1613_s23 = int_to_ptr.hbm [resolvable:$true] %s1612_s23 }
  0xd2   : > { %p1619_p2 = scmp.lt.s32.totalorder %s1613_s23, %s2280_s7 }
 0x113   : > { %v1520_v63 = vpop.permute.xlu2 %1519 }
 0x114   : > { %v1522_v0 = vunpack.i.h.bf16 %v1520_v63  ;;  %v1521_v1 = vunpack.i.l.bf16 %v1520_v63  ;;  %v1336_v63 = vld [vmem:[%s2276_s3 + $0x78] sm:$0xf] }
 0x116   : > { %v483_v3 = vsel %vm482_vm2, %v1521_v1, %v1522_v0  ;;  %v496_v5 = vmax.f32 %v451_v37, %v1522_v0  ;;  %v1450_v0 = vld [vmem:[%s2276_s3 + $0x80] sm:$0xf0]  ;;  %v1449_v1 = vld [vmem:[%s2276_s3 + $0x7c] sm:$0xf] }
 0x117   : > { %v495_v8 = vmax.f32 %v450_v36, %v483_v3  ;;  %v1337_v3 = vor.u32 %v1450_v0, %v1336_v63  ;;  %v1458_v0 = vld [vmem:[%s2276_s3 + $0xc4] sm:$0xf] }
 0x11b   : > { %v1525_v2 = vpop.permute.xlu2 %1524 }
 0x11c   : > { %v1527_v9 = vunpack.i.h.bf16 %v1525_v2  ;;  %v1526_v10 = vunpack.i.l.bf16 %v1525_v2  ;;  %v1338_v2 = vld [vmem:[%s2276_s3 + $0x84] sm:$0xf0] }
 0x11e   : > { %v484_v15 = vsel %vm482_vm2, %v1526_v10, %v1527_v9  ;;  %v498_v18 = vmax.f32 %v453_v45, %v1527_v9  ;;  %v1326_v9 = vld [vmem:[%s2276_s3 + $0x6c] sm:$0xf0] }
 0x11f   : > { %v497_v21 = vmax.f32 %v452_v44, %v484_v15  ;;  %v1408_v15 = vld [vmem:[%s2276_s3 + $0x108] sm:$0xf] }
 0x123   : > { %v1540_v16 = vpop.permute.xlu2 %1539 }
 0x124   : > { %v1542_v22 = vunpack.i.h.bf16 %v1540_v16  ;;  %v1541_v23 = vunpack.i.l.bf16 %v1540_v16 }
 0x126   : > { %v485_v28 = vsel %vm482_vm2, %v1541_v23, %v1542_v22  ;;  %v500_v30 = vmax.f32 %v455_v53, %v1542_v22  ;;  %v1455_v53 = vld [vmem:[%s2276_s3 + $0xac] sm:$0xf]  ;;  %v1410_v23 = vld [vmem:[%s2276_s3 + $0x114] sm:$0xf0] }
 0x127   : > { %v499_v33 = vmax.f32 %v454_v52, %v485_v28  ;;  %v1456_v52 = vld [vmem:[%s2276_s3 + $0xb0] sm:$0xf0]  ;;  %v1365_v58 = vor.u32 %v1455_v53, %v1362_v55  ;;  %v1467_v22 = vld [vmem:[%s2276_s3 + $0x10c] sm:$0xf]  ;;  %v1441_v28 = vld [vmem:[%s2276_s3 + $0x38] sm:$0xf0] }
 0x128   : > { %v1361_v54 = vor.u32 %v1456_v52, %v1360_v51  ;;  %v1461_v52 = vld [vmem:[%s2276_s3 + $0xdc] sm:$0xf]  ;;  %v1386_v53 = vld [vmem:[%s2276_s3 + $0xe4] sm:$0xf0]  ;;  %v1276_v55 = vld [vmem:[%s2276_s3] sm:$0xf] }
 0x129   : > { %929 = vmatpush.bf16.msrb.mxu0 %v1365_v58 }
 0x12a   : > { %891 = vmatpush.bf16.msra.mxu2 %v1361_v54  ;;  %v1389_v54 = vor.u32 %v1461_v52, %v1386_v53  ;;  %v1439_v52 = vld [vmem:[%s2276_s3 + $0x28] sm:$0xf0]  ;;  %v1380_v53 = vld [vmem:[%s2276_s3 + $0xc8] sm:$0xf] }
 0x12b   : > { %v1530_v4 = vpop.permute.xlu0 %1529  ;;  %v1555_v37 = vpop.permute.xlu2 %1554 }
 0x12c   : > { %v1532_v6 = vunpack.i.h.bf16 %v1530_v4  ;;  %v1531_v7 = vunpack.i.l.bf16 %v1530_v4  ;;  %v1557_v40 = vunpack.i.h.bf16 %v1555_v37  ;;  %v1556_v41 = vunpack.i.l.bf16 %v1555_v37 }
 0x12d   : > { %v1341_v4 = vor.u32 %v1449_v1, %v1338_v2  ;;  %v1374_v1 = vld [vmem:[%s2276_s3 + $0xcc] sm:$0xf0] }
 0x12e   : > { %v520_v11 = vsel %vm519_vm3, %v1531_v7, %v1532_v6  ;;  %v1796_v12 = vmax.f32 %v496_v5, %v1532_v6  ;;  %v523_v47 = vsel %vm519_vm3, %v1556_v41, %v1557_v40  ;;  %v1324_v5 = vld [vmem:[%s2276_s3 + $0x60] sm:$0xf]  ;;  %v1447_v6 = vld [vmem:[%s2276_s3 + $0x68] sm:$0xf0]  ;;  %v1446_v7 = vld [vmem:[%s2276_s3 + $0x64] sm:$0xf]  ;;  %v1377_v2 = vor.u32 %v1458_v0, %v1374_v1 }
 0x12f   : > { %v1798_v13 = vmax.f32 %v495_v8, %v520_v11  ;;  %v1325_v8 = vor.u32 %v1447_v6, %v1324_v5  ;;  %v1329_v10 = vor.u32 %v1446_v7, %v1326_v9  ;;  %v1312_v11 = vld [vmem:[%s2276_s3 + $0x48] sm:$0xf]  ;;  %v1288_v41 = vld [vmem:[%s2276_s3 + $0x18] sm:$0xf]  ;;  %v1416_v6 = vld [vmem:[%s2276_s3 + $0x110] sm:$0xf] }
 0x130   : > { %v1469_v7 = vld [vmem:[%s2276_s3 + $0x118] sm:$0xf0]  ;;  %v1284_v1 = vld [vmem:[%s2276_s3 + $0x8] sm:$0xf] }
 0x131   : > { %v1568_v14 = vpack.i.bf16 %v1796_v12, %v1798_v13  ;;  %v1417_v9 = vor.u32 %v1469_v7, %v1416_v6 }
 0x133   : > { %v1535_v17 = vpop.permute.xlu1 %1534  ;;  %1569 = vrot.lane.b32.xlu2 %v1568_v14, %s1665_s29  ;;  %1559 = vrot.lane.b32.xlu0 %v1568_v14, %s1666_s8  ;;  %v1444_v14 = vld [vmem:[%s2276_s3 + $0x50] sm:$0xf0] }
 0x134   : > { %v1537_v19 = vunpack.i.h.bf16 %v1535_v17  ;;  %v1536_v20 = vunpack.i.l.bf16 %v1535_v17  ;;  %v1313_v16 = vor.u32 %v1444_v14, %v1312_v11  ;;  %v1468_v17 = vld [vmem:[%s2276_s3 + $0x110] sm:$0xf0]  ;;  %v1344_v14 = vld [vmem:[%s2276_s3 + $0x80] sm:$0xf] }
 0x136   : > { %v521_v24 = vsel %vm519_vm3, %v1536_v20, %v1537_v19  ;;  %v1806_v25 = vmax.f32 %v498_v18, %v1537_v19  ;;  %v1443_v18 = vld [vmem:[%s2276_s3 + $0x4c] sm:$0xf]  ;;  %v1314_v19 = vld [vmem:[%s2276_s3 + $0x54] sm:$0xf0]  ;;  %v1409_v20 = vor.u32 %v1468_v17, %v1408_v15 }
 0x137   : > { %v1808_v26 = vmax.f32 %v497_v21, %v521_v24  ;;  %v1317_v21 = vor.u32 %v1443_v18, %v1314_v19  ;;  %v1413_v24 = vor.u32 %v1467_v22, %v1410_v23  ;;  %v1451_v15 = vld [vmem:[%s2276_s3 + $0x88] sm:$0xf0]  ;;  %v1404_v18 = vld [vmem:[%s2276_s3 + $0xf8] sm:$0xf]  ;;  %v1466_v19 = vld [vmem:[%s2276_s3 + $0x100] sm:$0xf0] }
 0x138   : > { %914 = vmatpush.bf16.msra.mxu3 %v1409_v20  ;;  %v1332_v20 = vld [vmem:[%s2276_s3 + $0x68] sm:$0xf] }
 0x139   : > { %v1563_v27 = vpack.i.bf16 %v1806_v25, %v1808_v26  ;;  %952 = vmatpush.bf16.msrb.mxu1 %v1413_v24  ;;  %v1405_v24 = vor.u32 %v1466_v19, %v1404_v18 }
 0x13b   : > { %v1550_v29 = vpop.permute.xlu1 %1549  ;;  %1564 = vrot.lane.b32.xlu1 %v1563_v27, %s1666_s8  ;;  %1574 = vrot.lane.b32.xlu0 %v1563_v27, %s1665_s29  ;;  %v1300_v27 = vld [vmem:[%s2276_s3 + $0x30] sm:$0xf] }
 0x13c   : > { %v1552_v31 = vunpack.i.h.bf16 %v1550_v29  ;;  %v1551_v32 = vunpack.i.l.bf16 %v1550_v29  ;;  %v1396_v29 = vld [vmem:[%s2276_s3 + $0xf0] sm:$0xf] }
 0x13e   : > { %v522_v34 = vsel %vm519_vm3, %v1551_v32, %v1552_v31  ;;  %v1816_v35 = vmax.f32 %v500_v30, %v1552_v31  ;;  %v1301_v30 = vor.u32 %v1441_v28, %v1300_v27  ;;  %v1465_v31 = vld [vmem:[%s2276_s3 + $0xf8] sm:$0xf0]  ;;  %v1440_v32 = vld [vmem:[%s2276_s3 + $0x34] sm:$0xf] }
 0x13f   : > { %v1818_v36 = vmax.f32 %v499_v33, %v522_v34  ;;  %v1302_v33 = vld [vmem:[%s2276_s3 + $0x3c] sm:$0xf0]  ;;  %v1397_v34 = vor.u32 %v1465_v31, %v1396_v29  ;;  %v1448_v27 = vld [vmem:[%s2276_s3 + $0x70] sm:$0xf0] }
 0x140   : > { %v1305_v37 = vor.u32 %v1440_v32, %v1302_v33  ;;  %v1333_v28 = vor.u32 %v1448_v27, %v1332_v20  ;;  %v1320_v32 = vld [vmem:[%s2276_s3 + $0x50] sm:$0xf]  ;;  %v1445_v33 = vld [vmem:[%s2276_s3 + $0x58] sm:$0xf0] }
 0x141   : > { %v1578_v38 = vpack.i.bf16 %v1816_v35, %v1818_v36  ;;  %915 = vmatpush.bf16.msra.mxu3 %v1397_v34 }
 0x143   : > { %v1545_v39 = vpop.permute.xlu0 %1544  ;;  %1579 = vrot.lane.b32.xlu1 %v1578_v38, %s1666_s8  ;;  %1589 = vrot.lane.b32.xlu0 %v1578_v38, %s1665_s29  ;;  %v1464_v38 = vld [vmem:[%s2276_s3 + $0xf4] sm:$0xf] }
 0x144   : > { %v1547_v42 = vunpack.i.h.bf16 %v1545_v39  ;;  %v1546_v43 = vunpack.i.l.bf16 %v1545_v39  ;;  %v1398_v39 = vld [vmem:[%s2276_s3 + $0xfc] sm:$0xf0] }
 0x146   : > { %v502_v44 = vmax.f32 %v457_v61, %v1547_v42  ;;  %v486_v45 = vsel %vm482_vm2, %v1546_v43, %v1547_v42  ;;  %v1349_v61 = vor.u32 %v1453_v57, %v1348_v56  ;;  %v1438_v42 = vld [vmem:[%s2276_s3 + $0x20] sm:$0xf0]  ;;  %v1384_v43 = vld [vmem:[%s2276_s3 + $0xd8] sm:$0xf]  ;;  %v1435_v56 = vld [vmem:[%s2276_s3 + $0x8] sm:$0xf0] }
 0x147   : > { %v501_v46 = vmax.f32 %v456_v60, %v486_v45  ;;  %v1350_v60 = vld [vmem:[%s2276_s3 + $0x9c] sm:$0xf0]  ;;  %v1462_v45 = vld [vmem:[%s2276_s3 + $0xe0] sm:$0xf0]  ;;  %v1277_v58 = vor.u32 %v1435_v56, %v1276_v55 }
 0x148   : > { %v1828_v48 = vmax.f32 %v502_v44, %v1557_v40  ;;  %v1353_v62 = vor.u32 %v1452_v59, %v1350_v60  ;;  %892 = vmatpush.bf16.msra.mxu2 %v1349_v61  ;;  %v1401_v40 = vor.u32 %v1464_v38, %v1398_v39  ;;  %v1289_v44 = vor.u32 %v1438_v42, %v1288_v41  ;;  %v1372_v57 = vld [vmem:[%s2276_s3 + $0xc0] sm:$0xf]  ;;  %v1459_v59 = vld [vmem:[%s2276_s3 + $0xc8] sm:$0xf0]  ;;  %v1434_v60 = vld [vmem:[%s2276_s3 + $0x4] sm:$0xf] }
 0x149   : > { %v1830_v49 = vmax.f32 %v501_v46, %v523_v47  ;;  %v1437_v46 = vld [vmem:[%s2276_s3 + $0x1c] sm:$0xf]  ;;  %v1290_v47 = vld [vmem:[%s2276_s3 + $0x24] sm:$0xf0]  ;;  %v1278_v61 = vld [vmem:[%s2276_s3 + $0xc] sm:$0xf0]  ;;  %v1321_v38 = vor.u32 %v1445_v33, %v1320_v32 }
 0x14a   : > { %930 = vmatpush.bf16.msrb.mxu0 %v1353_v62  ;;  %953 = vmatpush.bf16.msrb.mxu1 %v1401_v40  ;;  %v1293_v51 = vor.u32 %v1437_v46, %v1290_v47  ;;  %v1373_v62 = vor.u32 %v1459_v59, %v1372_v57  ;;  %v1281_v63 = vor.u32 %v1434_v60, %v1278_v61  ;;  %v1392_v39 = vld [vmem:[%s2276_s3 + $0xe0] sm:$0xf]  ;;  %v1463_v40 = vld [vmem:[%s2276_s3 + $0xe8] sm:$0xf0]  ;;  %v1308_v41 = vld [vmem:[%s2276_s3 + $0x38] sm:$0xf] }
 0x14b   : > { %v1593_v50 = vpack.i.bf16 %v1828_v48, %v1830_v49 }
 0x14c   : > { %893 = vmatpush.bf16.msra.mxu2 %v1337_v3  ;;  %v1368_v3 = vld [vmem:[%s2276_s3 + $0xb0] sm:$0xf] }
 0x14d   : > { %1594 = vrot.lane.b32.xlu1 %v1593_v50, %s1665_s29  ;;  %1584 = vrot.lane.b32.xlu2 %v1593_v50, %s1666_s8  ;;  %v1385_v50 = vor.u32 %v1462_v45, %v1384_v43  ;;  %v1296_v45 = vld [vmem:[%s2276_s3 + $0x20] sm:$0xf]  ;;  %s1614_s29 = scalar_lea.hbm %s1613_s23, 1 }
 0x14e   : > { %931 = vmatpush.bf16.msrb.mxu0 %v1341_v4  ;;  %954 = vmatpush.bf16.msrb.mxu1 %v1389_v54  ;;  %v1457_v4 = vld [vmem:[%s2276_s3 + $0xb8] sm:$0xf0]  ;;  %v1460_v54 = vld [vmem:[%s2276_s3 + $0xd0] sm:$0xf0]  ;;  %p1615_p13 = scmp.ne.s32.totalorder %s1613_s23, %s1614_s29  ;;  %p1620_p3 = scmp.lt.s32.totalorder %s1618_s9, %s1614_s29 }
 0x14f   : > { %916 = vmatpush.bf16.msra.mxu3 %v1385_v50  ;;  %v1369_v5 = vor.u32 %v1457_v4, %v1368_v3  ;;  %v1381_v60 = vor.u32 %v1460_v54, %v1380_v53  ;;  %v1086_v53 = vld [vmem:[%s2278_s5 + $0xd0] sm:$0xff]  ;;  %v1072_v54 = vld [vmem:[%s2278_s5 + $0x60] sm:$0xff] }
 0x150   : > { %894 = vmatpush.bf16.msra.mxu2 %v1325_v8  ;;  %v1356_v8 = vld [vmem:[%s2276_s3 + $0x98] sm:$0xf]  ;;  %p1616_p0 = pnand %p1615_p13, %p1745_p6  ;;  %p1621_p4 = por %p1620_p3, %p1619_p2 }
 0x152   : > { %932 = vmatpush.bf16.msrb.mxu0 %v1329_v10  ;;  %955 = vmatpush.bf16.msrb.mxu1 %v1377_v2  ;;  %v1454_v10 = vld [vmem:[%s2276_s3 + $0xa0] sm:$0xf0]  ;;  %v1436_v2 = vld [vmem:[%s2276_s3 + $0x10] sm:$0xf0]  ;;  %p1617_p1 = pneg %p1616_p0 }
 0x153   : > { %917 = vmatpush.bf16.msra.mxu3 %v1373_v62  ;;  %v1357_v11 = vor.u32 %v1454_v10, %v1356_v8  ;;  %v1297_v62 = vor.u32 %v1439_v52, %v1296_v45  ;;  %v1089_v45 = vld [vmem:[%s2278_s5 + $0xe8] sm:$0xff] }
 0x154   : > { %895 = vmatpush.bf16.msra.mxu2 %v1313_v16  ;;  %v1345_v16 = vor.u32 %v1451_v15, %v1344_v14  ;;  %v1073_v52 = vld [vmem:[%s2278_s5 + $0x68] sm:$0xff]  ;;  %p1622_p5 = pnand %p1621_p4, %p1617_p1 }
 0x156   : > { %933 = vmatpush.bf16.msrb.mxu0 %v1317_v21 }
 0x157   : > { %967 = vmatpush.bf16.msrb.mxu3 %v1369_v5 }
 0x158   : > { %896 = vmatpush.bf16.msra.mxu2 %v1301_v30 }
 0x15a   : > { %934 = vmatpush.bf16.msrb.mxu0 %v1305_v37 }
 0x15b   : > { %968 = vmatpush.bf16.msrb.mxu3 %v1357_v11 }
 0x15c   : > { %897 = vmatpush.bf16.msra.mxu2 %v1289_v44 }
 0x15e   : > { %935 = vmatpush.bf16.msrb.mxu0 %v1293_v51 }
 0x15f   : > { %969 = vmatpush.bf16.msrb.mxu3 %v1345_v16 }
 0x160   : > { %898 = vmatpush.bf16.msra.mxu2 %v1277_v58 }
 0x162   : > { %936 = vmatpush.bf16.msrb.mxu0 %v1281_v63 }
 0x163   : > { %970 = vmatpush.bf16.msrb.mxu3 %v1333_v28 }
 0x164   : > { %990 = vmatpush.bf16.msrb.mxu2 %v1417_v9 }
 0x167   : > { %971 = vmatpush.bf16.msrb.mxu3 %v1321_v38 }
 0x168   : > { %991 = vmatpush.bf16.msrb.mxu2 %v1405_v24 }
 0x18d   : > { %v1570_v21 = vpop.permute.xlu2 %1569 }
 0x18e   : > { %v1572_v30 = vunpack.i.h.bf16 %v1570_v21  ;;  %v1571_v31 = vunpack.i.l.bf16 %v1570_v21 }
 0x190   : > { %v602_v42 = vsel %vm601_vm5, %v1571_v31, %v1572_v30 }
 0x1a5   : > { %v1560_v17 = vpop.permute.xlu0 %1559 }
 0x1a6   : > { %v1562_v22 = vunpack.i.h.bf16 %v1560_v17  ;;  %v1561_v23 = vunpack.i.l.bf16 %v1560_v17 }
 0x1a7   : > { %v1585_v8 = vpop.permute.xlu2 %1584 }
 0x1a8   : > { %v565_v29 = vsel %vm564_vm4, %v1561_v23, %v1562_v22  ;;  %v578_v34 = vmax.f32 %v1796_v12, %v1562_v22  ;;  %v1393_v12 = vor.u32 %v1463_v40, %v1392_v39  ;;  %v1587_v19 = vunpack.i.h.bf16 %v1585_v8 }
 0x1a9   : > { %v577_v37 = vmax.f32 %v1798_v13, %v565_v29  ;;  %v1442_v13 = vld [vmem:[%s2276_s3 + $0x40] sm:$0xf0]  ;;  %v1586_v20 = vunpack.i.l.bf16 %v1585_v8 }
 0x1aa   : > { %v615_v55 = vmax.f32 %v578_v34, %v1572_v30  ;;  %992 = vmatpush.bf16.msrb.mxu2 %v1393_v12  ;;  %v1309_v57 = vor.u32 %v1442_v13, %v1308_v41  ;;  %v584_v32 = vmax.f32 %v1828_v48, %v1587_v19  ;;  %v1091_v48 = vld [vmem:[%s2278_s5 + $0xf8] sm:$0xff]  ;;  %v1064_v8 = vld [vmem:[%s2278_s5 + $0x20] sm:$0xff] }
 0x1ab   : > { %v614_v56 = vmax.f32 %v577_v37, %v602_v42  ;;  %v568_v27 = vsel %vm564_vm4, %v1586_v20, %v1587_v19  ;;  %1124 = vmatpush.msra.mxu1 %v1091_v48  ;;  %v1061_v19 = vld [vmem:[%s2278_s5 + $0x8] sm:$0xff]  ;;  %v1060_v20 = vld [vmem:[%s2278_s5] sm:$0xff] }
 0x1ac   : > { %972 = vmatpush.bf16.msrb.mxu3 %v1309_v57  ;;  %v1084_v57 = vld [vmem:[%s2278_s5 + $0xc0] sm:$0xff] }
 0x1ad   : > { %v1565_v43 = vpop.permute.xlu1 %1564  ;;  %v1575_v44 = vpop.permute.xlu0 %1574  ;;  %v622_v3 = vpack.c.bf16 %v615_v55, %v614_v56  ;;  %v1085_v55 = vld [vmem:[%s2278_s5 + $0xc8] sm:$0xff]  ;;  %v1071_v56 = vld [vmem:[%s2278_s5 + $0x58] sm:$0xff] }
 0x1ae   : > { %v1567_v46 = vunpack.i.h.bf16 %v1565_v43  ;;  %v1566_v47 = vunpack.i.l.bf16 %v1565_v43  ;;  %v1577_v50 = vunpack.i.h.bf16 %v1575_v44  ;;  %v1576_v51 = vunpack.i.l.bf16 %v1575_v44  ;;  %993 = vmatpush.bf16.msrb.mxu2 %v1381_v60  ;;  %v1069_v60 = vld [vmem:[%s2278_s5 + $0x48] sm:$0xff] }
 0x1af   : > { %v678_v10 = vunpack.c.l.b16 %v622_v3  ;;  %v679_v14 = vunpack.c.h.b16 %v622_v3  ;;  %v1080_v3 = vld [vmem:[%s2278_s5 + $0xa0] sm:$0xff] }
 0x1b0   : > { %v580_v58 = vmax.f32 %v1806_v25, %v1567_v46  ;;  %v566_v59 = vsel %vm564_vm4, %v1566_v47, %v1567_v46  ;;  %v603_v0 = vsel %vm601_vm5, %v1576_v51, %v1577_v50  ;;  %973 = vmatpush.bf16.msrb.mxu3 %v1297_v62  ;;  %v1075_v46 = vld [vmem:[%s2278_s5 + $0x78] sm:$0xff]  ;;  %v1088_v47 = vld [vmem:[%s2278_s5 + $0xe0] sm:$0xff] }
 0x1b1   : > { %v579_v61 = vmax.f32 %v1808_v26, %v566_v59  ;;  %v1285_v26 = vor.u32 %v1436_v2, %v1284_v1  ;;  %1104 = vmatpush.msra.mxu0 %v1075_v46  ;;  %v1087_v51 = vld [vmem:[%s2278_s5 + $0xd8] sm:$0xff]  ;;  %v1068_v62 = vld [vmem:[%s2278_s5 + $0x40] sm:$0xff] }
 0x1b2   : > { %v617_v63 = vmax.f32 %v580_v58, %v1577_v50  ;;  %v1074_v50 = vld [vmem:[%s2278_s5 + $0x70] sm:$0xff]  ;;  %v1083_v59 = vld [vmem:[%s2278_s5 + $0xb8] sm:$0xff] }
 0x1b3   : > { %v616_v25 = vmax.f32 %v579_v61, %v603_v0  ;;  %1105 = vmatpush.msra.mxu0 %v1074_v50  ;;  %v1070_v58 = vld [vmem:[%s2278_s5 + $0x50] sm:$0xff]  ;;  %v1067_v2 = vld [vmem:[%s2278_s5 + $0x38] sm:$0xff]  ;;  %v1097_v50 = vld [vmem:[%s2278_s5 + $0x128] sm:$0xff] }
 0x1b4   : > { %974 = vmatpush.bf16.msrb.mxu3 %v1285_v26  ;;  %v1082_v61 = vld [vmem:[%s2278_s5 + $0xb0] sm:$0xff] }
 0x1b5   : > { %v623_v4 = vpack.c.bf16 %v617_v63, %v616_v25  ;;  %v1580_v5 = vpop.permute.xlu1 %1579  ;;  %v1590_v9 = vpop.permute.xlu0 %1589  ;;  %1106 = vmatpush.msra.mxu0 %v1073_v52  ;;  %v1081_v63 = vld [vmem:[%s2278_s5 + $0xa8] sm:$0xff]  ;;  %v1066_v25 = vld [vmem:[%s2278_s5 + $0x30] sm:$0xff] }
 0x1b6   : > { %v1582_v6 = vunpack.i.h.bf16 %v1580_v5  ;;  %v1581_v7 = vunpack.i.l.bf16 %v1580_v5  ;;  %v1592_v21 = vunpack.i.h.bf16 %v1590_v9  ;;  %v1591_v22 = vunpack.i.l.bf16 %v1590_v9  ;;  %v1077_v9 = vld [vmem:[%s2278_s5 + $0x88] sm:$0xff] }
 0x1b7   : > { %v680_v11 = vunpack.c.l.b16 %v623_v4  ;;  %v681_v15 = vunpack.c.h.b16 %v623_v4  ;;  %1107 = vmatpush.msra.mxu0 %v1072_v54  ;;  %v1079_v4 = vld [vmem:[%s2278_s5 + $0x98] sm:$0xff] }
 0x1b8   : > { %v567_v16 = vsel %vm564_vm4, %v1581_v7, %v1582_v6  ;;  %v582_v23 = vmax.f32 %v1816_v35, %v1582_v6  ;;  %v604_v28 = vsel %vm601_vm5, %v1591_v22, %v1592_v21  ;;  %v583_v35 = vmax.f32 %v1830_v49, %v568_v27  ;;  %v1090_v49 = vld [vmem:[%s2278_s5 + $0xf0] sm:$0xff]  ;;  %v1065_v6 = vld [vmem:[%s2278_s5 + $0x28] sm:$0xff] }
 0x1b9   : > { %v686_v17 = vpack.c.b16 %v680_v11, %v678_v10  ;;  %v687_v18 = vpack.c.b16 %v681_v15, %v679_v14  ;;  %v581_v24 = vmax.f32 %v1818_v36, %v567_v16  ;;  %1125 = vmatpush.msra.mxu1 %v1090_v49  ;;  %1108 = vmatpush.msra.mxu0 %v1071_v56  ;;  %v1078_v7 = vld [vmem:[%s2278_s5 + $0x90] sm:$0xff]  ;;  %v1063_v14 = vld [vmem:[%s2278_s5 + $0x18] sm:$0xff]  ;;  %v1076_v15 = vld [vmem:[%s2278_s5 + $0x80] sm:$0xff] }
 0x1ba   : > { %v619_v29 = vmax.f32 %v582_v23, %v1592_v21  ;;  %v1062_v16 = vld [vmem:[%s2278_s5 + $0x10] sm:$0xff]  ;;  %v1014_v56 = vld [vmem:[%s2277_s4 + $0x48] sm:$0xff] }
 0x1bb   : > { %899 = vmatmul.bf16.vlgmr.msra.gmra.mxu2 %v686_v17  ;;  %1418 = vmatmul.msk.bf16.vlgmr.msra.gmra.mxu3 %vm884_vm6, %v687_v18  ;;  %v618_v30 = vmax.f32 %v581_v24, %v604_v28  ;;  %v1009_v24 = vld [vmem:[%s2277_s4 + $0x20] sm:$0xff] }
 0x1bc   : > { %937 = vmatmul.bf16.vlgmr.msrb.gmra.mxu0 %v686_v17  ;;  %1420 = vmatmul.msk.bf16.vlgmr.msrb.gmra.mxu1 %vm884_vm6, %v687_v18 }
 0x1bd   : > { %v624_v38 = vpack.c.bf16 %v619_v29, %v618_v30  ;;  %1126 = vmatpush.msra.mxu1 %v1089_v45  ;;  %1109 = vmatpush.msra.mxu0 %v1070_v58  ;;  %v1099_v29 = vld [vmem:[%s2278_s5 + $0x138] sm:$0xff]  ;;  %v1006_v30 = vld [vmem:[%s2277_s4 + $0x8] sm:$0xff] }
 0x1be   : > { %1152 = vmatpush.msra.mxu3 %v1099_v29 }
 0x1bf   : > { %v1595_v31 = vpop.permute.xlu1 %1594  ;;  %v682_v41 = vunpack.c.l.b16 %v624_v38  ;;  %v683_v43 = vunpack.c.h.b16 %v624_v38  ;;  %1127 = vmatpush.msra.mxu1 %v1088_v47  ;;  %1110 = vmatpush.msra.mxu0 %v1069_v60  ;;  %v1098_v47 = vld [vmem:[%s2278_s5 + $0x130] sm:$0xff] }
 0x1c0   : > { %v1597_v33 = vunpack.i.h.bf16 %v1595_v31  ;;  %v1596_v34 = vunpack.i.l.bf16 %v1595_v31  ;;  %v1012_v31 = vld [vmem:[%s2277_s4 + $0x38] sm:$0xff]  ;;  %1153 = vmatpush.msra.mxu3 %v1098_v47 }
 0x1c1   : > { %1128 = vmatpush.msra.mxu1 %v1087_v51  ;;  %1111 = vmatpush.msra.mxu0 %v1068_v62 }
 0x1c2   : > { %v605_v36 = vsel %vm601_vm5, %v1596_v34, %v1597_v33  ;;  %v621_v37 = vmax.f32 %v584_v32, %v1597_v33  ;;  %1154 = vmatpush.msra.mxu3 %v1097_v50 }
 0x1c3   : > { %v620_v39 = vmax.f32 %v583_v35, %v605_v36  ;;  %1129 = vmatpush.msra.mxu1 %v1086_v53  ;;  %1112 = vmatpush.msra.mxu0 %v1067_v2 }
 0x1c5   : > { %v625_v40 = vpack.c.bf16 %v621_v37, %v620_v39  ;;  %1130 = vmatpush.msra.mxu1 %v1085_v55  ;;  %1113 = vmatpush.msra.mxu0 %v1066_v25  ;;  %v1008_v37 = vld [vmem:[%s2277_s4 + $0x18] sm:$0xff] }
 0x1c7   : > { %v684_v42 = vunpack.c.l.b16 %v625_v40  ;;  %v685_v44 = vunpack.c.h.b16 %v625_v40  ;;  %1131 = vmatpush.msra.mxu1 %v1084_v57  ;;  %1114 = vmatpush.msra.mxu0 %v1065_v6  ;;  %v1096_v6 = vld [vmem:[%s2278_s5 + $0x120] sm:$0xff] }
 0x1c8   : > { %1155 = vmatpush.msra.mxu3 %v1096_v6 }
 0x1c9   : > { %v688_v12 = vpack.c.b16 %v684_v42, %v682_v41  ;;  %v689_v13 = vpack.c.b16 %v685_v44, %v683_v43  ;;  %1132 = vmatpush.msra.mxu1 %v1083_v59  ;;  %1115 = vmatpush.msra.mxu0 %v1064_v8  ;;  %v1015_v43 = vld [vmem:[%s2277_s4 + $0x50] sm:$0xff]  ;;  %v1005_v44 = vld [vmem:[%s2277_s4] sm:$0xff] }
 0x1cb   : > { %904 = vmatmul.bf16.gmra.mxu2 %v688_v12  ;;  %1419 = vmatmul.msk.bf16.gmra.mxu3 %vm884_vm6, %v689_v13 }
 0x1cc   : > { %942 = vmatmul.bf16.gmra.mxu0 %v688_v12  ;;  %1421 = vmatmul.msk.bf16.gmra.mxu1 %vm884_vm6, %v689_v13 }
 0x1cd   : > { %1133 = vmatpush.msra.mxu1 %v1082_v61  ;;  %1116 = vmatpush.msra.mxu0 %v1063_v14 }
 0x1cf   : > { %1134 = vmatpush.msra.mxu1 %v1081_v63  ;;  %1117 = vmatpush.msra.mxu0 %v1062_v16 }
 0x1d1   : > { %1135 = vmatpush.msra.mxu1 %v1080_v3  ;;  %1118 = vmatpush.msra.mxu0 %v1061_v19 }
 0x1d3   : > { %1136 = vmatpush.msra.mxu1 %v1079_v4  ;;  %1119 = vmatpush.msra.mxu0 %v1060_v20  ;;  %v1010_v20 = vld [vmem:[%s2277_s4 + $0x28] sm:$0xff] }
 0x1d5   : > { %1137 = vmatpush.msra.mxu1 %v1078_v7 }
 0x1d7   : > { %1138 = vmatpush.msra.mxu1 %v1077_v9  ;;  %v1095_v9 = vld [vmem:[%s2278_s5 + $0x118] sm:$0xff] }
 0x1d8   : > { %1156 = vmatpush.msra.mxu3 %v1095_v9 }
 0x1d9   : > { %1139 = vmatpush.msra.mxu1 %v1076_v15 }
 0x1db   : > { %975 = vmatmul.bf16.vlgmr.msrb.gmra.mxu3 %v686_v17  ;;  %1422 = vmatmul.msk.bf16.vlgmr.msrb.gmra.mxu2 %vm884_vm6, %v687_v18 }
 0x1eb   : > { %980 = vmatmul.bf16.gmra.mxu3 %v688_v12  ;;  %1423 = vmatmul.msk.bf16.gmra.mxu2 %vm884_vm6, %v689_v13  ;;  %v1011_v13 = vld [vmem:[%s2277_s4 + $0x30] sm:$0xff] }
 0x239   : > { %v938_v0 = vpop.f32.mrf.mxu0  ;;  %v957_v1 = vpop.f32.mrf.mxu1 }
 0x23a   : > { %v958_v27 = vadd.f32 %v957_v1, %v938_v0 }
 0x23c   : > { %v1018_v36 = vmul.f32 %v1006_v30, %v958_v27  ;;  %v1007_v27 = vld [vmem:[%s2277_s4 + $0x10] sm:$0xff] }
 0x23e   : > { %v900_v5 = vpop.f32.mrf.mxu2  ;;  %v919_v26 = vpop.f32.mrf.mxu3 }
 0x23f   : > { %v920_v39 = vadd.f32 %v919_v26, %v900_v5 }
 0x241   : > { %v940_v10 = vpop.f32.mrf.mxu0  ;;  %v959_v11 = vpop.f32.mrf.mxu1  ;;  %v1017_v51 = vmul.f32 %v1005_v44, %v920_v39 }
 0x242   : > { %v960_v23 = vadd.f32 %v959_v11, %v940_v10  ;;  %v1094_v11 = vld [vmem:[%s2278_s5 + $0x110] sm:$0xff] }
 0x243   : > { %1157 = vmatpush.msra.mxu3 %v1094_v11 }
 0x244   : > { %v1021_v32 = vmul.f32 %v1009_v24, %v960_v23 }
 0x246   : > { %v902_v17 = vpop.f32.mrf.mxu2  ;;  %v921_v18 = vpop.f32.mrf.mxu3  ;;  %v1038_v12 = vadd.f32 %v1021_v32, %v1018_v36 }
 0x247   : > { %v922_v35 = vadd.f32 %v921_v18, %v902_v17  ;;  %v1093_v17 = vld [vmem:[%s2278_s5 + $0x108] sm:$0xff]  ;;  %v1092_v18 = vld [vmem:[%s2278_s5 + $0x100] sm:$0xff] }
 0x248   : > { %1158 = vmatpush.msra.mxu3 %v1093_v17 }
 0x249   : > { %v943_v21 = vpop.f32.mrf.mxu0  ;;  %v962_v22 = vpop.f32.mrf.mxu1  ;;  %v1020_v49 = vmul.f32 %v1008_v37, %v922_v35  ;;  %v1016_v35 = vld [vmem:[%s2277_s4 + $0x58] sm:$0xff] }
 0x24a   : > { %v963_v28 = vadd.f32 %v962_v22, %v943_v21  ;;  %1159 = vmatpush.msra.mxu3 %v1092_v18 }
 0x24b   : > { %v1029_v57 = vadd.f32 %v1020_v49, %v1017_v51 }
 0x24c   : > { %v1024_v38 = vmul.f32 %v1012_v31, %v963_v28  ;;  %v1013_v28 = vld [vmem:[%s2277_s4 + $0x40] sm:$0xff] }
 0x24e   : > { %v905_v33 = vpop.f32.mrf.mxu2  ;;  %v924_v34 = vpop.f32.mrf.mxu3  ;;  %v1039_v45 = vadd.f32 %v1038_v12, %v1024_v38 }
 0x24f   : > { %v925_v40 = vadd.f32 %v924_v34, %v905_v33 }
 0x251   : > { %v945_v41 = vpop.f32.mrf.mxu0  ;;  %v964_v42 = vpop.f32.mrf.mxu1  ;;  %v1023_v52 = vmul.f32 %v1011_v13, %v925_v40 }
 0x252   : > { %v965_v48 = vadd.f32 %v964_v42, %v945_v41 }
 0x253   : > { %v1030_v60 = vadd.f32 %v1029_v57, %v1023_v52 }
 0x254   : > { %v1027_v46 = vmul.f32 %v1015_v43, %v965_v48 }
 0x256   : > { %v1040_v53 = vadd.f32 %v1039_v45, %v1027_v46  ;;  %v907_v54 = vpop.f32.mrf.mxu2  ;;  %v926_v55 = vpop.f32.mrf.mxu3  ;;  %v1100_v46 = vld [vmem:[%s2279_s6] sm:$0x1] }
 0x257   : > { %v927_v58 = vadd.f32 %v926_v55, %v907_v54 }
 0x258   : > { %v1041_v59 = vrot.slane %v1040_v53, 4 }
 0x259   : > { %v1026_v61 = vmul.f32 %v1014_v56, %v927_v58 }
 0x25a   : > { %v1042_v62 = vadd.f32 %v1041_v59, %v1040_v53 }
 0x25b   : > { %v1031_v63 = vadd.f32 %v1030_v60, %v1026_v61 }
 0x25c   : > { %v1043_v0 = vrot.slane %v1042_v62, 2 }
 0x25d   : > { %v1032_v1 = vrot.slane %v1031_v63, 4 }
 0x25e   : > { %v1044_v2 = vadd.f32 %v1043_v0, %v1042_v62  ;;  %v976_v3 = vpop.f32.mrf.mxu3  ;;  %v995_v25 = vpop.f32.mrf.mxu2 }
 0x25f   : > { %v1033_v4 = vadd.f32 %v1032_v1, %v1031_v63  ;;  %v996_v23 = vadd.f32 %v995_v25, %v976_v3 }
 0x260   : > { %v1045_v5 = vrot.slane %v1044_v2, 1 }
 0x261   : > { %v1034_v26 = vrot.slane %v1033_v4, 2  ;;  %v1019_v30 = vmul.f32 %v1007_v27, %v996_v23 }
 0x262   : > { %v1046_v7 = vadd.f32 %v1045_v5, %v1044_v2 }
 0x263   : > { %v1035_v8 = vadd.f32 %v1034_v26, %v1033_v4  ;;  %v1047_v36 = vsel %vm884_vm6, %v1019_v30, 0.0 }
 0x264   : > { %1140 = vmatmul.f32.vlgmr.msra.gmra.mxu1 %v1046_v7 }
 0x265   : > { %v1036_v10 = vrot.slane %v1035_v8, 1 }
 0x266   : > { %v978_v14 = vpop.f32.mrf.mxu3  ;;  %v997_v15 = vpop.f32.mrf.mxu2 }
 0x267   : > { %v1037_v16 = vadd.f32 %v1036_v10, %v1035_v8  ;;  %v998_v19 = vadd.f32 %v997_v15, %v978_v14 }
 0x269   : > { %1120 = vmatmul.f32.vlgmr.msra.gmra.mxu0 %v1037_v16  ;;  %v1022_v29 = vmul.f32 %v1010_v20, %v998_v19 }
 0x26b   : > { %v1048_v32 = vsel %vm884_vm6, %v1022_v29, 0.0 }
 0x26c   : > { %v1049_v39 = vadd.f32 %v1048_v32, %v1047_v36 }
 0x26e   : > { %v981_v21 = vpop.f32.mrf.mxu3  ;;  %v1000_v22 = vpop.f32.mrf.mxu2 }
 0x26f   : > { %v1001_v24 = vadd.f32 %v1000_v22, %v981_v21 }
 0x271   : > { %v1025_v31 = vmul.f32 %v1013_v28, %v1001_v24 }
 0x273   : > { %v1050_v37 = vsel %vm884_vm6, %v1025_v31, 0.0 }
 0x274   : > { %v1051_v41 = vadd.f32 %v1050_v37, %v1049_v39 }
 0x276   : > { %v983_v33 = vpop.f32.mrf.mxu3  ;;  %v1002_v34 = vpop.f32.mrf.mxu2 }
 0x277   : > { %v1003_v38 = vadd.f32 %v1002_v34, %v983_v33 }
 0x279   : > { %v1028_v40 = vmul.f32 %v1016_v35, %v1003_v38 }
 0x27b   : > { %v1052_v42 = vsel %vm884_vm6, %v1028_v40, 0.0 }
 0x27c   : > { %v1053_v43 = vadd.f32 %v1052_v42, %v1051_v41 }
 0x27e   : > { %v1054_v44 = vrot.slane %v1053_v43, 4 }
 0x280   : > { %v1055_v12 = vadd.f32 %v1054_v44, %v1053_v43 }
 0x282   : > { %v1056_v13 = vrot.slane %v1055_v12, 2 }
 0x284   : > { %v1057_v48 = vadd.f32 %v1056_v13, %v1055_v12 }
 0x286   : > { %v1058_v49 = vrot.slane %v1057_v48, 1 }
 0x288   : > { %v1059_v45 = vadd.f32 %v1058_v49, %v1057_v48 }
 0x28a   : > { %1424 = vmatmul.msk.f32.vlgmr.msra.gmra.mxu3 %vm884_vm6, %v1059_v45 }
 0x2e1   : > { %v1141_v51 = vpop.f32.mrf.mxu1 }
 0x2e6   : > { %v1121_v47 = vpop.f32.mrf.mxu0 }
 0x2e7   : > { %v1122_v50 = vadd.f32 %v1121_v47, %v1100_v46 }
 0x2e9   : > { %v1142_v52 = vadd.f32 %v1141_v51, %v1122_v50 }
 0x30d   : > { %v1161_v53 = vpop.f32.mrf.mxu3 }
 0x30e   : > { %v1162_v54 = vadd.f32 %v1161_v53, %v1142_v52 }
 0x310   : > { %1165 = vst.msk [vmem:[%s327_s18] sm:$0x1] %vm1164_vm7, %v1162_v54 }
 0x311   : > { %1625 = shalt.err (!%p1622_p5)
}
 0x312   : > { %1472 = dma.vmem_to_hbm [thread:$0]  (%p1745_p6), %s1178_s19, 16, %s1180_s21, %s1167_s22  }
 0x313 PF: > { %s1191_s20 = sand.u32 1, %s1648_s24   ;;  %p1475_p7 = pnand %p1242_p9, %p1749_p8 }
 0x314   : > { %s1192_s15 = scalar_lea.sflag [#allocation4], %s1191_s20 }
 0x315   : > { %p1476_p10 = pneg %p1475_p7 }
 0x317   : > { %1643 = dma.done.wait (%p1476_p10), %s1192_s15, 16  }
 0x318   : > { %1645 = vsyncadd (%p1476_p10), %s1192_s15, 4294967280  ;;  %p17_p11 = scmp.ge.s32.totalorder %s1730_s30, 4   ;;  %s2283_s24 = smov %s1652_s25 }
 0x319   : > { %s2284_s25 = smov %s1656_s26  ;;  %s2285_s26 = smov %s1743_s10 }
 0x31a   : > { %s2286_s27 = smov %s1730_s30  ;;  %19 = sbr.rel (!%p17_p11) target bundleno = 3 (0x3), region = 126 }
 0x31f   :  { %1197 = vsyncpa [#allocation4], 1 }
 0x320   :  { %1199 = vsyncpa [#allocation4 + $0x1], 1 }

</bundles_post_ra>
